<compile_context>
chip_gen: v5e
topology: v5e:2x2
jax: 0.10.0
libtpu: 0.0.40
codegen_flags: <defaults>
</compile_context>

<pallas_src>
import functools
import math

import jax
import jax.numpy as jnp
from jax import lax
from jax.experimental import pallas as pl
from jax.experimental.pallas import tpu as pltpu

_MIB = 1024 * 1024


# ---------------------------------------------------------------------------
# Path 1: small vocabulary -> table resident in VMEM, gather = one-hot matmul.
# ---------------------------------------------------------------------------
def _embedding_onehot_kernel(ids_ref, emb_ref, out_ref, *, scale):
    # ids_ref : VMEM (T, 1) int32   token ids for this block (ids on sublanes)
    # emb_ref : VMEM (V, D)         full table (constant block index -> resident)
    # out_ref : VMEM (T, D)
    T = ids_ref.shape[0]
    V = emb_ref.shape[0]
    iota = lax.broadcasted_iota(jnp.int32, (T, V), 1)          # (T, V)
    onehot = (ids_ref[...] == iota).astype(emb_ref.dtype)      # (T, V)
    gathered = jnp.dot(onehot, emb_ref[...],
                       preferred_element_type=jnp.float32)     # (T, D) f32
    out_ref[...] = (gathered * scale).astype(out_ref.dtype)


# ---------------------------------------------------------------------------
# Path 2: large vocabulary -> table stays in HBM, per-row DMA gather.
# ---------------------------------------------------------------------------
def _embedding_gather_kernel(ids_ref, emb_hbm, out_ref, buf, sems, *,
                             tokens_per_block, steps_per_core, scale):
    # ids_ref : SMEM (n_padded,) int32  scalar-prefetched token ids
    # emb_hbm : HBM  (V, D)             embedding table, never copied whole
    # out_ref : VMEM (T, D)             output tile for this grid step
    # buf     : VMEM (2, T, D)          double-buffered row staging
    # sems    : DMA semaphores (2,)     ONE aggregate semaphore per slot
    T = tokens_per_block
    c = pl.program_id(0)                  # core index ("parallel" axis)
    i = pl.program_id(1)                  # step within this core ("arbitrary")
    n_inner = pl.num_programs(1)
    blk = c * steps_per_core + i          # global token-block index
    slot = i % 2
    next_slot = (i + 1) % 2

    def start_fetch(block_idx, s):
        base = block_idx * T

        # fori_loop with an 8-way statically unrolled body: keeps the DMA
        # descriptor-issue pipeline full without a full T-way static unroll.
        def body(t8, carry):
            t0 = pl.multiple_of(t8 * 8, 8)
            for u in range(8):
                tok = ids_ref[base + t0 + u]
                pltpu.make_async_copy(
                    emb_hbm.at[pl.ds(tok, 1), :],
                    buf.at[s, pl.ds(t0 + u, 1), :],
                    sems.at[s],            # every row signals the slot's sem
                ).start()
            return carry

        lax.fori_loop(0, T // 8, body, None)

    # Prime the pipeline on the first step of this core's range.
    @pl.when(i == 0)
    def _():
        start_fetch(blk, 0)

    # Prefetch the next block's rows while this block's DMAs are in flight.
    @pl.when(i + 1 < n_inner)
    def _():
        start_fetch(blk + 1, next_slot)

    # ONE aggregate wait: T row DMAs of D*itemsize bytes each signalled
    # sems[slot]; one (T, D)-sized shape-only descriptor consumes all of them.
    pltpu.make_async_copy(buf.at[slot], buf.at[slot], sems.at[slot]).wait()

    # One dense, lane-aligned scaled store for the whole tile.
    # TODO(synk): for bf16/int8 tables, stage rows through a uint32 view so the
    # per-row DMAs land on full 32-bit sublanes instead of packed partial rows.
    out_ref[...] = (buf[slot].astype(jnp.float32) * scale).astype(out_ref.dtype)


# ---------------------------------------------------------------------------
# Wrapper.
# ---------------------------------------------------------------------------
def _staging_budget_bytes() -> int:
    """Per-generation VMEM budget for (2,T,D) staging + 2x (T,D) out tiles."""
    try:
        kind = jax.devices()[0].device_kind.lower()
    except Exception:
        return 8 * _MIB
    if "v6" in kind or "trillium" in kind:
        return 24 * _MIB            # 128 MiB physical VMEM
    if "v5 lite" in kind or "v5e" in kind or "v5lite" in kind:
        return 12 * _MIB            # 16 MiB default scoped VMEM
    if "v4" in kind or "v5" in kind:
        return 16 * _MIB
    return 12 * _MIB                # v7x / unknown: 64 MiB physical, stay modest


def _round_up(x: int, m: int) -> int:
    return ((x + m - 1) // m) * m


def input_embeddings(ids: jax.Array, emb_table: jax.Array, *,
                     max_tokens_per_block: int = 256,
                     allow_vmem_table: bool = True) -> jax.Array:
    """ids: (B, S) int; emb_table: (V, D). Returns emb_table[ids] * sqrt(D)."""
    B, S = ids.shape
    V, D = emb_table.shape
    n_tokens = B * S
    itemsize = emb_table.dtype.itemsize
    scale = float(math.sqrt(D))

    # Native sublane tile for the table dtype: 8 (f32) / 16 (bf16) / 32 (int8).
    sublane = max(8, 32 // itemsize)

    # Pick T: as large as possible (amortize ~0.35 us/step grid overhead) while
    # the staging + double-buffered output tiles stay inside the VMEM budget.
    budget = _staging_budget_bytes()
    T = max(sublane, (max_tokens_per_block // sublane) * sublane)
    while T > sublane and 4 * T * D * itemsize > budget:
        T = max(sublane, ((T // 2) // sublane) * sublane)
    T = min(T, _round_up(max(n_tokens, 1), sublane))

    ids_flat = ids.reshape(-1).astype(jnp.int32)

    # ------------- fast path: whole table fits comfortably in VMEM ----------
    if allow_vmem_table and V <= 1024 and V * D * itemsize <= 4 * _MIB:
        n_padded = _round_up(n_tokens, T)
        if n_padded != n_tokens:
            ids_flat = jnp.pad(ids_flat, (0, n_padded - n_tokens))
        ids_col = ids_flat.reshape(n_padded, 1)
        out_flat = pl.pallas_call(
            functools.partial(_embedding_onehot_kernel, scale=scale),
            out_shape=jax.ShapeDtypeStruct((n_padded, D), emb_table.dtype),
            grid=(n_padded // T,),
            in_specs=[
                pl.BlockSpec((T, 1), lambda i: (i, 0)),
                pl.BlockSpec((V, D), lambda i: (0, 0)),    # resident table
            ],
            out_specs=pl.BlockSpec((T, D), lambda i: (i, 0)),
            compiler_params=pltpu.CompilerParams(
                dimension_semantics=("parallel",)),
        )(ids_col, emb_table)
        return out_flat[:n_tokens].reshape(B, S, D)

    # ------------- DMA-gather path -------------------------------------------
    n_blocks = pl.cdiv(n_tokens, T)
    # Split blocks across v7x's two TensorCores when there is enough work;
    # on single-core chips the outer axis is just a harmless nested loop.
    num_cores = 2 if n_blocks >= 4 else 1
    n_blocks = _round_up(n_blocks, num_cores)
    steps_per_core = n_blocks // num_cores
    n_padded = n_blocks * T
    if n_padded != n_tokens:
        ids_flat = jnp.pad(ids_flat, (0, n_padded - n_tokens))

    kernel = functools.partial(
        _embedding_gather_kernel,
        tokens_per_block=T, steps_per_core=steps_per_core, scale=scale)

    vmem_needed = 4 * T * D * itemsize
    vmem_limit = int(min(max(2 * vmem_needed, 16 * _MIB), 32 * _MIB))

    out_flat = pl.pallas_call(
        kernel,
        out_shape=jax.ShapeDtypeStruct((n_padded, D), emb_table.dtype),
        grid_spec=pltpu.PrefetchScalarGridSpec(
            num_scalar_prefetch=1,                       # ids -> SMEM
            grid=(num_cores, steps_per_core),
            in_specs=[
                pl.BlockSpec(memory_space=pl.ANY),       # table stays in HBM
            ],
            out_specs=pl.BlockSpec(
                (T, D), lambda c, i, ids_sref: (c * steps_per_core + i, 0)),
            scratch_shapes=[
                pltpu.VMEM((2, T, D), emb_table.dtype),  # double-buffered rows
                pltpu.SemaphoreType.DMA((2,)),           # ONE sem per slot
            ],
        ),
        compiler_params=pltpu.CompilerParams(
            # Outer axis: independent per-core block ranges (megacore on v7x).
            # Inner axis: cross-step DMA prefetch carries state -> arbitrary.
            dimension_semantics=("parallel", "arbitrary"),
            vmem_limit_bytes=vmem_limit,
        ),
    )(ids_flat, emb_table)

    return out_flat[:n_tokens].reshape(B, S, D)


if __name__ == "__main__":
    d_model = 128
    vocab_size = 64
    batch, seq = 2, 8

    key = jax.random.PRNGKey(0)
    k_ids, k_emb = jax.random.split(key)

    # nn.Embedding default weight ~ N(0, 1).
    emb_table = jax.random.normal(k_emb, (vocab_size, d_model), dtype=jnp.float32)
    ids = jax.random.randint(k_ids, (batch, seq), 0, vocab_size, dtype=jnp.int32)
    ref = emb_table[ids] * math.sqrt(d_model)

    # 1) VMEM fast path (small vocab -> on-chip one-hot gather).
    out = jax.block_until_ready(input_embeddings(ids, emb_table))
    assert out.shape == (batch, seq, d_model)
    assert jnp.allclose(out, ref, atol=1e-5, rtol=1e-5)

    # 2) HBM DMA-gather path, single core, multiple steps: exercises the
    #    cross-step double-buffered prefetch + aggregate semaphore wait.
    out2 = jax.block_until_ready(
        input_embeddings(ids, emb_table, max_tokens_per_block=8,
                         allow_vmem_table=False))
    assert jnp.allclose(out2, ref, atol=1e-5, rtol=1e-5)

    # 3) HBM DMA-gather path with enough blocks to trigger the 2-D
    #    (parallel, arbitrary) grid that splits blocks across TensorCores.
    ids_big = jax.random.randint(jax.random.PRNGKey(1), (4, 32), 0, vocab_size,
                                 dtype=jnp.int32)
    ref_big = emb_table[ids_big] * math.sqrt(d_model)
    out3 = jax.block_until_ready(
        input_embeddings(ids_big, emb_table, max_tokens_per_block=8,
                         allow_vmem_table=False))
    assert jnp.allclose(out3, ref_big, atol=1e-5, rtol=1e-5)

    print("KERNEL_OK")
</pallas_src>

<mosaic_0001>
module attributes {stable_mosaic.version = 11 : i64} {
  func.func @_embedding_onehot_kernel(%arg0: i32, %arg1: memref<16x1xi32, #tpu.memory_space<vmem>>, %arg2: memref<64x128xf32, #tpu.memory_space<vmem>>, %arg3: memref<16x128xf32, #tpu.memory_space<vmem>>) attributes {dimension_semantics = [#tpu.dimension_semantics<parallel>], iteration_bounds = array<i64: 1>, scalar_prefetch = 0 : i64, scratch_operands = 0 : i64, tpu.core_type = #tpu.core_type<tc>, window_params = [{transform_indices = @transform_0, window_bounds = array<i64: 16, 1>}, {pipeline_mode = #tpu.pipeline_mode<synchronous>, transform_indices = @transform_1, window_bounds = array<i64: 64, 128>}, {transform_indices = @transform_2, window_bounds = array<i64: 16, 128>}]} {
    %0 = tpu.iota {dimensions = array<i32: 1>} : vector<16x64xi32>
    %c0 = arith.constant 0 : index
    %c0_0 = arith.constant 0 : index
    %1 = vector.load %arg1[%c0, %c0_0] : memref<16x1xi32, #tpu.memory_space<vmem>>, vector<16x1xi32>
    %2 = vector.broadcast %1 : vector<16x1xi32> to vector<16x64xi32>
    %3 = arith.cmpi eq, %2, %0 : vector<16x64xi32>
    %4 = arith.extui %3 : vector<16x64xi1> to vector<16x64xi32>
    %5 = arith.sitofp %4 : vector<16x64xi32> to vector<16x64xf32>
    %c0_1 = arith.constant 0 : index
    %c0_2 = arith.constant 0 : index
    %6 = vector.load %arg2[%c0_1, %c0_2] : memref<64x128xf32, #tpu.memory_space<vmem>>, vector<64x128xf32>
    %cst = arith.constant dense<0.000000e+00> : vector<16x128xf32>
    %7 = tpu.matmul %5, %6, %cst {dimension_numbers = #tpu.dot_dimension_numbers<[1], [0], [0], [1], [0, 0, 1, 1], [], []>} : vector<16x64xf32>, vector<64x128xf32>, vector<16x128xf32> -> vector<16x128xf32>
    %cst_3 = arith.constant 11.3137083 : f32
    %8 = vector.broadcast %cst_3 : f32 to vector<16x128xf32>
    %9 = arith.mulf %7, %8 : vector<16x128xf32>
    %c0_4 = arith.constant 0 : index
    %c0_5 = arith.constant 0 : index
    %10 = vector.load %arg3[%c0_4, %c0_5] : memref<16x128xf32, #tpu.memory_space<vmem>>, vector<16x128xf32>
    tpu.vector_store %arg3[%c0_4, %c0_5], %9 {strides = array<i32>} : memref<16x128xf32, #tpu.memory_space<vmem>>, vector<16x128xf32>,
    return
  }
  func.func @transform_0(%arg0: i32) -> (i32, i32) {
    %c0_i32 = arith.constant 0 : i32
    %c0_i32_0 = arith.constant 0 : i32
    return %arg0, %c0_i32 : i32, i32
  }
  func.func @transform_1(%arg0: i32) -> (i32, i32) {
    %c0_i32 = arith.constant 0 : i32
    %c0_i32_0 = arith.constant 0 : i32
    %c0_i32_1 = arith.constant 0 : i32
    return %c0_i32, %c0_i32_0 : i32, i32
  }
  func.func @transform_2(%arg0: i32) -> (i32, i32) {
    %c0_i32 = arith.constant 0 : i32
    %c0_i32_0 = arith.constant 0 : i32
    return %arg0, %c0_i32 : i32, i32
  }
}

</mosaic_0001>

<bundles_post_ra>
// kernel: tpu_custom_call.1
= control target key start
LH: loop header
LB: loop body
LE: loop exit
PB: predicated region body
PF: predicated region fallthrough
CT: control target
= control target key end

     0   :  { %7 = vsyncpa [#allocation3], 0  ;;  %s215_s0 = inlined_call_operand.vmem [shape: s32[16,1], index: 0, kind: input, shape index: {}]   ;;  %s216_s1 = inlined_call_operand.hbm [shape: f32[64,128], index: 1, kind: input, shape index: {}]   ;;  %s217_s2 = inlined_call_operand.hbm [shape: f32[16,128], index: 2, kind: output, shape index: {}]  }
   0x1   :  { %8 = vsyncpa [#allocation4], 0  ;;  %s15_s11 = sshll.u32 %s216_s1, 4  ;;  %s176_s12 = smov [#allocation2]   ;;  %s16_s11 = int_to_ptr.hbm [resolvable:$true] %s15_s11 }
   0x2   :  { %s17_s13 = sshll.u32 %s176_s12, 4  ;;  %s177_s14 = smov 128   ;;  %s18_s13 = int_to_ptr.vmem [resolvable:$true] %s17_s13 }
   0x3   :  { %s178_s15 = smov 8  }
   0x4   :  { %23 = dma.hbm_to_vmem [thread:$0]  %s16_s11, 1024, %s18_s13, [#allocation3], %s177_s14, %s177_s14, %s178_s15  }
   0x5   :  { %172 = dma.done.wait [#allocation3], 1024  }
   0x6   :  { %173 = vsyncadd [#allocation3], 4294966272  ;;  %v179_v0 = vmov 0   ;;  %v30_v1 = vld [vmem:[%s215_s0] sm:$0xff]  ;;  %v51_v2 = vld [vmem:[#allocation2 + $0x38] sm:$0xff]  ;;  %v28_v11 = vlaneseq  ;;  %vm52_vm0 = vcmask 523264  }
   0x7   :  { %123 = vset.pattern.permute.xlu0 %v179_v0  ;;  %67 = vmatpush.msra.mxu0 %v51_v2  ;;  %v50_v3 = vld [vmem:[#allocation2 + $0x30] sm:$0xff]  ;;  %v49_v4 = vld [vmem:[#allocation2 + $0x28] sm:$0xff]  ;;  %v48_v5 = vld [vmem:[#allocation2 + $0x20] sm:$0xff]  ;;  %v180_v14 = vmov 0.0   ;;  %s92_s22 = sshll.u32 %s217_s2, 4  ;;  %s93_s22 = int_to_ptr.hbm [resolvable:$true] %s92_s22 }
   0x8   :  { %33 = vperm.xlu0 %123, %v30_v1   ;;  %109 = vmatpush.msra.mxu1 %v51_v2  ;;  %v31_v6 = vld [vmem:[%s215_s0 + $0x8] sm:$0xff]  ;;  %v47_v7 = vld [vmem:[#allocation2 + $0x18] sm:$0xff]  ;;  %v46_v8 = vld [vmem:[#allocation2 + $0x10] sm:$0xff]  ;;  %v29_v12 = vand.u32 127, %v28_v11  ;;  %s181_s0 = smov [#allocation5]  }
   0x9   :  { %68 = vmatpush.msra.mxu0 %v50_v3  ;;  %v45_v9 = vld [vmem:[#allocation2 + $0x8] sm:$0xff]  ;;  %v44_v10 = vld [vmem:[#allocation2] sm:$0xff]  ;;  %s90_s19 = sshll.u32 %s181_s0, 4  ;;  %s91_s19 = int_to_ptr.vmem [resolvable:$true] %s90_s19 }
   0xa   :  { %110 = vmatpush.msra.mxu1 %v50_v3 }
   0xb   :  { %69 = vmatpush.msra.mxu0 %v49_v4 }
   0xc   :  { %111 = vmatpush.msra.mxu1 %v49_v4 }
   0xd   :  { %70 = vmatpush.msra.mxu0 %v48_v5 }
   0xe   :  { %112 = vmatpush.msra.mxu1 %v48_v5 }
   0xf   :  { %71 = vmatpush.msra.mxu0 %v47_v7 }
  0x10   :  { %36 = vperm.xlu0 %123, %v31_v6   ;;  %113 = vmatpush.msra.mxu1 %v47_v7 }
  0x11   :  { %72 = vmatpush.msra.mxu0 %v46_v8 }
  0x12   :  { %114 = vmatpush.msra.mxu1 %v46_v8 }
  0x13   :  { %73 = vmatpush.msra.mxu0 %v45_v9 }
  0x14   :  { %115 = vmatpush.msra.mxu1 %v45_v9 }
  0x15   :  { %74 = vmatpush.msra.mxu0 %v44_v10 }
  0x16   :  { %116 = vmatpush.msra.mxu1 %v44_v10 }
  0x7a   :  { %v34_v13 = vpop.permute.xlu0 %33 }
  0x7b   :  { %vm38_vm1 = vcmp.eq.s32.totalorder %v34_v13, %v29_v12 }
  0x7c   :  { %v105_v15 = vsel %vm38_vm1, 1.0, %v180_v14 }
  0x7d   :  { %107 = vmatmul.msk.f32.vlgmr.msra.gmra.mxu0 %vm52_vm0, %v105_v15 }
  0x82   :  { %v37_v16 = vpop.permute.xlu0 %36 }
  0x83   :  { %vm39_vm2 = vcmp.eq.s32.totalorder %v37_v16, %v29_v12 }
  0x84   :  { %v106_v17 = vsel %vm39_vm2, 1.0, %v180_v14 }
  0x85   :  { %108 = vmatmul.msk.f32.vlgmr.msra.gmra.mxu1 %vm52_vm0, %v106_v17 }
  0xfa   :  { %v76_v18 = vpop.f32.mrf.mxu0 }
  0xfb   :  { %v82_v19 = vmul.f32 11.313708, %v76_v18 }
  0xfd   :  { %84 = vst [vmem:[#allocation5] sm:$0xff] %v82_v19 }
 0x102   :  { %v79_v20 = vpop.f32.mrf.mxu1 }
 0x103   :  { %v83_v21 = vmul.f32 11.313708, %v79_v20 }
 0x105   :  { %85 = vst [vmem:[#allocation5 + $0x8] sm:$0xff] %v83_v21 }
 0x106   :  { %98 = dma.vmem_to_hbm [thread:$0]  %s91_s19, 256, %s93_s22, [#allocation4], %s177_s14, %s177_s14, %s178_s15  }
 0x107   :  { %174 = dma.done.wait [#allocation4], 256  }
 0x108   :  { %175 = vsyncadd [#allocation4], 4294967040 }
 0x109   :  { %103 = vsyncpa [#allocation3], 1 }
 0x10a   :  { %104 = vsyncpa [#allocation4], 1 }

</bundles_post_ra>
